<compile_context>
chip_gen: v7x
topology: tpu7x:2x2x1
jax: 0.10.0
libtpu: 0.0.40
codegen_flags: <defaults>
</compile_context>

<pallas_src>
import functools

import jax
import jax.numpy as jnp
from jax.experimental import pallas as pl
from jax.experimental.pallas import tpu as pltpu


def _ceil_to(n, m):
    return (n + m - 1) // m * m


def _device_traits():
    """Best-effort TPU generation probe; falls back to conservative defaults."""
    kind = ""
    try:
        kind = jax.devices()[0].device_kind.lower()
    except Exception:
        pass
    # Chips where the grid's "parallel" axis is sharded across >1 TensorCore.
    multi_tc = any(t in kind for t in ("v4", "v5p", "v7", "7x"))
    # Chips with a bf16 VPU (elementwise bf16 is native): v6e / v7x.
    bf16_valu = any(t in kind for t in ("v6", "v7", "7x"))
    vmem_cap = 64 << 20  # conservative default (v7x per-TC VMEM)
    try:
        vmem_cap = int(pltpu.get_tpu_info().vmem_capacity_bytes)
    except Exception:
        pass
    return multi_tc, bf16_valu, vmem_cap


def se_kernel(x_ref, w1_ref, w2_ref, o_ref, *, gate_bf16):
    # x_ref: (TB, C), w1_ref: (C, Hp), w2_ref: (Hp, C), o_ref: (TB, C)
    x = x_ref[...]                                    # native I/O dtype (f32 or bf16)
    # Linear(C -> H, bias=False) + ReLU; MXU accumulates in f32.
    h = jnp.maximum(
        jnp.dot(x, w1_ref[...], preferred_element_type=jnp.float32), 0.0
    )
    # Keep the second matmul MXU-native in the weight dtype (no-op on f32 path).
    h = h.astype(w2_ref.dtype)
    z = jnp.dot(h, w2_ref[...], preferred_element_type=jnp.float32)
    # sigmoid(z) == 0.5*(tanh(z/2)+1): single EUP op, no stable-sigmoid
    # select/divide VALU work over the full (TB, C) tile.
    y = 0.5 * (jnp.tanh(0.5 * z) + 1.0)
    if gate_bf16:
        # bf16 VPU available (v6e/v7x): gate in bf16, single narrow store.
        o_ref[...] = x * y.astype(o_ref.dtype)
    else:
        # v5e (no bf16 VPU) or f32 I/O: gate in f32.
        o_ref[...] = (x.astype(jnp.float32) * y).astype(o_ref.dtype)


def prepare_se_weights(w1_t, w2_t, dtype=jnp.float32):
    """Pad the hidden dim to a lane-dense multiple of 128 and cast once.

    w1_t: (C, H)  == Linear(C, H, bias=False).weight.T
    w2_t: (H, C)  == Linear(H, C, bias=False).weight.T
    Padded hidden columns/rows are zero: they pass ReLU unchanged and multiply
    zero rows of W2, so the result is bit-identical to the unpadded math.
    Call this ONCE per weight set (kept out of the per-step call path).
    """
    C, H = w1_t.shape
    Hp = _ceil_to(max(H, 128), 128)
    w1_p = jnp.zeros((C, Hp), dtype).at[:, :H].set(w1_t.astype(dtype))
    w2_p = jnp.zeros((Hp, C), dtype).at[:H, :].set(w2_t.astype(dtype))
    return w1_p, w2_p


def se_layer(x, w1_p, w2_p, *, tile_b=8192):
    """x: (B, C) f32 or bf16; w1_p: (C, Hp), w2_p: (Hp, C) from prepare_se_weights."""
    B, C = x.shape
    Hp = w1_p.shape[1]
    assert w1_p.shape == (C, Hp) and w2_p.shape == (Hp, C)

    multi_tc, bf16_valu, vmem_cap = _device_traits()
    x_item = x.dtype.itemsize
    w_item = w1_p.dtype.itemsize
    sub = 16 if x_item == 2 else 8          # min sublane granularity

    # --- batch tile: as large as the VMEM budget allows --------------------
    # Per-grid-step overhead is ~0.35 us; with only ~1 MiB/step at tb=1024 that
    # overhead is 20-50% of the step (worst on v7x), so we target multi-MiB tiles.
    tb = min(tile_b, B)
    # Multi-TC chips (megacore): >=4 grid steps (>=2 per core) so each core
    # keeps prefetch/writeback overlap.  Never force-split on 1-TC chips.
    if multi_tc and B >= 4 * sub:
        tb = min(tb, -(-B // 4))
    # VMEM budget: double-buffered in+out tiles + ~4 f32 tile-sized
    # intermediates + double-buffered weights, capped at 48 MiB so it fits
    # v7x's 64 MiB/TC with headroom (v5e/v6e have 128 MiB physical).
    bytes_per_row = 2 * 2 * C * x_item + 4 * 4 * max(C, Hp)
    weight_bytes = 2 * 2 * C * Hp * w_item
    budget = min(48 << 20, (vmem_cap * 3) // 4) - weight_bytes
    tb = min(tb, max(budget // bytes_per_row, sub))
    tb = _ceil_to(max(tb, sub), sub)

    # --- pad ragged batch up to a whole number of tiles (zero rows are inert) ---
    Bp = _ceil_to(B, tb)
    xp = x if Bp == B else jnp.pad(x, ((0, Bp - B), (0, 0)))
    grid = (Bp // tb,)

    used = tb * bytes_per_row + weight_bytes
    # Explicit limit: v5e's 16 MiB scoped default would reject/de-pipeline
    # large tiles; 56 MiB ceiling stays under v7x's 64 MiB physical VMEM.
    vmem_limit = int(min(56 << 20, max(32 << 20, used + (8 << 20))))

    gate_bf16 = bool(bf16_valu and x.dtype == jnp.bfloat16)

    cost = pl.CostEstimate(
        flops=4 * Bp * C * Hp + Bp * C,                 # two matmuls + gating mul
        transcendentals=Bp * C,                          # tanh (sigmoid)
        bytes_accessed=2 * Bp * C * x_item + 2 * C * Hp * w_item,
    )

    out = pl.pallas_call(
        functools.partial(se_kernel, gate_bf16=gate_bf16),
        out_shape=jax.ShapeDtypeStruct((Bp, C), x.dtype),
        grid_spec=pltpu.PrefetchScalarGridSpec(
            num_scalar_prefetch=0,
            grid=grid,
            in_specs=[
                pl.BlockSpec((tb, C), lambda i: (i, 0)),   # streamed x tiles
                pl.BlockSpec((C, Hp), lambda i: (0, 0)),   # grid-invariant W1ᵀ (VMEM-resident)
                pl.BlockSpec((Hp, C), lambda i: (0, 0)),   # grid-invariant W2ᵀ (VMEM-resident)
            ],
            out_specs=pl.BlockSpec((tb, C), lambda i: (i, 0)),
        ),
        compiler_params=pltpu.CompilerParams(
            dimension_semantics=("parallel",),
            vmem_limit_bytes=vmem_limit,
        ),
        cost_estimate=cost,
    )(xp, w1_p, w2_p)

    return out if Bp == B else out[:B]


def se_layer_ref(x, w1_t, w2_t):
    xf = x.astype(jnp.float32)
    h = jnp.maximum(
        jnp.dot(xf, w1_t.astype(jnp.float32), precision=jax.lax.Precision.HIGHEST), 0.0
    )
    y = jax.nn.sigmoid(
        jnp.dot(h, w2_t.astype(jnp.float32), precision=jax.lax.Precision.HIGHEST)
    )
    return xf * y


if __name__ == "__main__":
    # Module config: channel=128, reduction=16 -> hidden=8
    B, C, reduction = 8, 128, 16
    Hd = C // reduction

    key = jax.random.PRNGKey(0)
    kx, k1, k2 = jax.random.split(key, 3)

    x = jax.random.normal(kx, (B, C), dtype=jnp.float32)
    # PyTorch Linear weight shapes: (out, in). Transpose for row-major matmuls.
    w1 = jax.random.normal(k1, (Hd, C), dtype=jnp.float32) * 0.1   # Linear(C, H).weight
    w2 = jax.random.normal(k2, (C, Hd), dtype=jnp.float32) * 0.1   # Linear(H, C).weight
    w1_t = w1.T  # (C, H)
    w2_t = w2.T  # (H, C)

    # --- f32 path ---
    w1_p, w2_p = prepare_se_weights(w1_t, w2_t, jnp.float32)
    out = jax.block_until_ready(se_layer(x, w1_p, w2_p))
    ref = se_layer_ref(x, w1_t, w2_t)
    assert jnp.allclose(out, ref, atol=2e-5, rtol=2e-5), "f32 mismatch vs reference"

    # --- bf16 I/O path (bf16 x + bf16 weights straight to the MXU; f32 accumulate) ---
    xb = x.astype(jnp.bfloat16)
    w1_pb, w2_pb = prepare_se_weights(w1_t, w2_t, jnp.bfloat16)
    outb = jax.block_until_ready(se_layer(xb, w1_pb, w2_pb))
    refb = se_layer_ref(xb, w1_t, w2_t)
    assert outb.dtype == jnp.bfloat16
    assert jnp.allclose(outb.astype(jnp.float32), refb, atol=5e-2, rtol=5e-2), \
        "bf16 mismatch vs reference"

    print("KERNEL_OK")
</pallas_src>

<mosaic_0001>
module attributes {stable_mosaic.version = 11 : i64} {
  func.func @se_kernel(%arg0: i32, %arg1: memref<8x128xf32, #tpu.memory_space<vmem>>, %arg2: memref<128x128xf32, #tpu.memory_space<vmem>>, %arg3: memref<128x128xf32, #tpu.memory_space<vmem>>, %arg4: memref<8x128xf32, #tpu.memory_space<vmem>>) attributes {dimension_semantics = [#tpu.dimension_semantics<parallel>], iteration_bounds = array<i64: 1>, scalar_prefetch = 0 : i64, scratch_operands = 0 : i64, tpu.core_type = #tpu.core_type<tc>, window_params = [{transform_indices = @transform_0, window_bounds = array<i64: 8, 128>}, {pipeline_mode = #tpu.pipeline_mode<synchronous>, transform_indices = @transform_1, window_bounds = array<i64: 128, 128>}, {pipeline_mode = #tpu.pipeline_mode<synchronous>, transform_indices = @transform_2, window_bounds = array<i64: 128, 128>}, {transform_indices = @transform_3, window_bounds = array<i64: 8, 128>}]} {
    %c0 = arith.constant 0 : index
    %c0_0 = arith.constant 0 : index
    %0 = vector.load %arg1[%c0, %c0_0] : memref<8x128xf32, #tpu.memory_space<vmem>>, vector<8x128xf32>
    %c0_1 = arith.constant 0 : index
    %c0_2 = arith.constant 0 : index
    %1 = vector.load %arg2[%c0_1, %c0_2] : memref<128x128xf32, #tpu.memory_space<vmem>>, vector<128x128xf32>
    %cst = arith.constant dense<0.000000e+00> : vector<8x128xf32>
    %2 = tpu.matmul %0, %1, %cst {dimension_numbers = #tpu.dot_dimension_numbers<[1], [0], [0], [1], [0, 0, 1, 1], [], []>} : vector<8x128xf32>, vector<128x128xf32>, vector<8x128xf32> -> vector<8x128xf32>
    %cst_3 = arith.constant 0.000000e+00 : f32
    %3 = vector.broadcast %cst_3 : f32 to vector<8x128xf32>
    %4 = arith.maximumf %2, %3 : vector<8x128xf32>
    %c0_4 = arith.constant 0 : index
    %c0_5 = arith.constant 0 : index
    %5 = vector.load %arg3[%c0_4, %c0_5] : memref<128x128xf32, #tpu.memory_space<vmem>>, vector<128x128xf32>
    %cst_6 = arith.constant dense<0.000000e+00> : vector<8x128xf32>
    %6 = tpu.matmul %4, %5, %cst_6 {dimension_numbers = #tpu.dot_dimension_numbers<[1], [0], [0], [1], [0, 0, 1, 1], [], []>} : vector<8x128xf32>, vector<128x128xf32>, vector<8x128xf32> -> vector<8x128xf32>
    %cst_7 = arith.constant 5.000000e-01 : f32
    %7 = vector.broadcast %cst_7 : f32 to vector<8x128xf32>
    %8 = arith.mulf %7, %6 : vector<8x128xf32>
    %9 = math.tanh %8 : vector<8x128xf32>
    %cst_8 = arith.constant 1.000000e+00 : f32
    %10 = vector.broadcast %cst_8 : f32 to vector<8x128xf32>
    %11 = arith.addf %9, %10 : vector<8x128xf32>
    %cst_9 = arith.constant 5.000000e-01 : f32
    %12 = vector.broadcast %cst_9 : f32 to vector<8x128xf32>
    %13 = arith.mulf %12, %11 : vector<8x128xf32>
    %14 = arith.mulf %0, %13 : vector<8x128xf32>
    %c0_10 = arith.constant 0 : index
    %c0_11 = arith.constant 0 : index
    %15 = vector.load %arg4[%c0_10, %c0_11] : memref<8x128xf32, #tpu.memory_space<vmem>>, vector<8x128xf32>
    tpu.vector_store %arg4[%c0_10, %c0_11], %14 {strides = array<i32>} : memref<8x128xf32, #tpu.memory_space<vmem>>, vector<8x128xf32>,
    return
  }
  func.func @transform_0(%arg0: i32) -> (i32, i32) {
    %c0_i32 = arith.constant 0 : i32
    %c0_i32_0 = arith.constant 0 : i32
    return %arg0, %c0_i32 : i32, i32
  }
  func.func @transform_1(%arg0: i32) -> (i32, i32) {
    %c0_i32 = arith.constant 0 : i32
    %c0_i32_0 = arith.constant 0 : i32
    %c0_i32_1 = arith.constant 0 : i32
    return %c0_i32, %c0_i32_0 : i32, i32
  }
  func.func @transform_2(%arg0: i32) -> (i32, i32) {
    %c0_i32 = arith.constant 0 : i32
    %c0_i32_0 = arith.constant 0 : i32
    %c0_i32_1 = arith.constant 0 : i32
    return %c0_i32, %c0_i32_0 : i32, i32
  }
  func.func @transform_3(%arg0: i32) -> (i32, i32) {
    %c0_i32 = arith.constant 0 : i32
    %c0_i32_0 = arith.constant 0 : i32
    return %arg0, %c0_i32 : i32, i32
  }
}

</mosaic_0001>

<bundles_post_ra>
// kernel: tpu_custom_call.1
= control target key start
LH: loop header
LB: loop body
LE: loop exit
PB: predicated region body
PF: predicated region fallthrough
CT: control target
= control target key end

     0   :  { %8 = vsyncpa [#allocation3], 0  ;;  %s606_s0 = inlined_call_operand.hbm [shape: f32[8,128], index: 0, kind: input, shape index: {}]   ;;  %s607_s1 = inlined_call_operand.hbm [shape: f32[128,128], index: 1, kind: input, shape index: {}]   ;;  %s608_s2 = inlined_call_operand.hbm [shape: f32[128,128], index: 2, kind: input, shape index: {}]   ;;  %s609_s3 = inlined_call_operand.hbm [shape: f32[8,128], index: 3, kind: output, shape index: {}]  }
   0x1   :  { %9 = vsyncpa [#allocation6], 0 }
   0x2   :  { %10 = vsyncpa [#allocation4], 0  ;;  %s507_s12 = smov [#allocation5]   ;;  %s413_s16 = scalar_lea.hbm %s607_s1, 2048 }
   0x3   :  { %s26_s13 = sshll.u32 %s507_s12, 4  ;;  %p414_p0 = scmp.ne.s32.totalorder %s607_s1, %s413_s16  ;;  %s27_s13 = int_to_ptr.vmem [resolvable:$true] %s26_s13 }
   0x4   :  { %p417_p1 = scmp.lt.u32.totalorder %s413_s16, %s607_s1 }
   0x6   :  { %p419_p2 = pnand %p417_p1, %p414_p0 }
   0x8   :  { %422 = shalt.err (!%p419_p2)
}
   0x9   :  { %s423_s21 = scalar_lea.vmem %s27_s13, 2048  ;;  %p428_p4 = scmp.lt.s32.totalorder %s27_s13, %s27_s13 }
   0xa   :  { %p424_p3 = scmp.ne.s32.totalorder %s27_s13, %s423_s21  ;;  %p429_p5 = scmp.lt.s32.totalorder %s423_s21, %s423_s21 }
   0xc   :  { %p430_p6 = por %p429_p5, %p428_p4 }
   0xe   :  { %p431_p7 = pnand %p430_p6, %p424_p3 }
  0x10   :  { %434 = shalt.err (!%p431_p7)
}
  0x11   :  { %s508_s22 = smov 128   ;;  %s509_s23 = smov 8  }
  0x12   :  { %32 = dma.hbm_to_vmem [thread:$0]  %s607_s1, 2048, %s27_s13, [#allocation6], %s508_s22, %s508_s22, %s509_s23  }
  0x13   :  { %s510_s26 = smov [#allocation2]   ;;  %s511_s28 = smov [#allocation7]  }
  0x14   :  { %s17_s27 = sshll.u32 %s510_s26, 4  ;;  %s38_s29 = sshll.u32 %s511_s28, 4  ;;  %s18_s27 = int_to_ptr.vmem [resolvable:$true] %s17_s27  ;;  %s39_s29 = int_to_ptr.vmem [resolvable:$true] %s38_s29 }
  0x15   :  { %s435_s5 = scalar_lea.hbm %s606_s0, 128 }
  0x16   :  { %p436_p8 = scmp.ne.s32.totalorder %s606_s0, %s435_s5  ;;  %p439_p9 = scmp.lt.u32.totalorder %s435_s5, %s606_s0 }
  0x18   :  { %p441_p10 = pnand %p439_p9, %p436_p8 }
  0x1a   :  { %444 = shalt.err (!%p441_p10)
}
  0x1b   :  { %s445_s1 = scalar_lea.vmem %s18_s27, 128  ;;  %p450_p12 = scmp.lt.s32.totalorder %s18_s27, %s18_s27 }
  0x1c   :  { %p446_p11 = scmp.ne.s32.totalorder %s18_s27, %s445_s1  ;;  %p451_p13 = scmp.lt.s32.totalorder %s445_s1, %s445_s1 }
  0x1e   :  { %p452_p0 = por %p451_p13, %p450_p12 }
  0x20   :  { %p453_p1 = pnand %p452_p0, %p446_p11 }
  0x22   :  { %456 = shalt.err (!%p453_p1)
}
  0x23   :  { %20 = dma.hbm_to_vmem [thread:$0]  %s606_s0, 128, %s18_s27, [#allocation3]  }
  0x24   :  { %s457_s14 = scalar_lea.hbm %s608_s2, 2048 }
  0x25   :  { %p458_p2 = scmp.ne.s32.totalorder %s608_s2, %s457_s14  ;;  %p461_p3 = scmp.lt.u32.totalorder %s457_s14, %s608_s2 }
  0x27   :  { %p463_p4 = pnand %p461_p3, %p458_p2 }
  0x29   :  { %466 = shalt.err (!%p463_p4)
}
  0x2a   :  { %s467_s19 = scalar_lea.vmem %s39_s29, 2048  ;;  %p472_p6 = scmp.lt.s32.totalorder %s39_s29, %s39_s29 }
  0x2b   :  { %p468_p5 = scmp.ne.s32.totalorder %s39_s29, %s467_s19  ;;  %p473_p7 = scmp.lt.s32.totalorder %s467_s19, %s467_s19 }
  0x2d   :  { %p474_p8 = por %p473_p7, %p472_p6 }
  0x2f   :  { %p475_p9 = pnand %p474_p8, %p468_p5 }
  0x31   :  { %478 = shalt.err (!%p475_p9)
}
  0x32   :  { %44 = dma.hbm_to_vmem [thread:$0]  %s608_s2, 2048, %s39_s29, [#allocation6], %s508_s22, %s508_s22, %s509_s23  }
  0x33   :  { %501 = dma.done.wait [#allocation3], 128  }
  0x34   :  { %502 = vsyncadd [#allocation3], 4294967168 }
  0x35   :  { %503 = dma.done.wait [#allocation6], 4096  }
  0x36   :  { %504 = vsyncadd [#allocation6], 4294963200  ;;  %v512_v0 = vmov 0.0|0.0   ;;  %vm513_vm0 = vmmov 0   ;;  %v514_v1 = vmov 0.0   ;;  %v55_v2 = vld [vmem:[#allocation5] sm:$0xff] }
  0x37   :  { %354 = vmatprep.subr.bf16.mxu0 %v512_v0  ;;  %316 = vmatprep.mubr.msk.f32.mxu0 %vm513_vm0, %v514_v1  ;;  %v56_v3 = vld [vmem:[#allocation5 + $0x8] sm:$0xff]  ;;  %v57_v4 = vld [vmem:[#allocation5 + $0x10] sm:$0xff]  ;;  %v58_v6 = vld [vmem:[#allocation5 + $0x18] sm:$0xff]  ;;  %s515_s2 = smov [#allocation8]  }
  0x38   :  { %378 = vmatprep.subr.bf16.mxu1 %v512_v0  ;;  %351 = vmatprep.mubr.msk.f32.mxu1 %vm513_vm0, %v514_v1  ;;  %v355_v5 = vpack.c.bf16 %v56_v3, %v55_v2  ;;  %v358_v7 = vpack.c.bf16 %v58_v6, %v57_v4  ;;  %v59_v8 = vld [vmem:[#allocation5 + $0x20] sm:$0xff]  ;;  %v60_v9 = vld [vmem:[#allocation5 + $0x28] sm:$0xff]  ;;  %v144_v12 = vld [vmem:[#allocation7 + $0x10] sm:$0xff]  ;;  %s240_s21 = sshll.u32 %s515_s2, 4  ;;  %s241_s21 = int_to_ptr.vmem [resolvable:$true] %s240_s21 }
  0x39   :  { %v142_v10 = vld [vmem:[#allocation7] sm:$0xff]  ;;  %v143_v11 = vld [vmem:[#allocation7 + $0x8] sm:$0xff]  ;;  %v145_v13 = vld [vmem:[#allocation7 + $0x18] sm:$0xff]  ;;  %v361_v14 = vpack.c.bf16 %v60_v9, %v59_v8  ;;  %s479_s22 = scalar_lea.vmem %s241_s21, 128  ;;  %p484_p11 = scmp.lt.s32.totalorder %s241_s21, %s241_s21 }
  0x3a   :  { %356 = vmatpush3.bf16.msra.mxu0 %v355_v5  ;;  %v379_v15 = vpack.c.bf16 %v143_v11, %v142_v10  ;;  %v61_v16 = vld [vmem:[#allocation5 + $0x30] sm:$0xff]  ;;  %v62_v17 = vld [vmem:[#allocation5 + $0x38] sm:$0xff]  ;;  %v382_v18 = vpack.c.bf16 %v145_v13, %v144_v12  ;;  %v146_v19 = vld [vmem:[#allocation7 + $0x20] sm:$0xff]  ;;  %p480_p10 = scmp.ne.s32.totalorder %s241_s21, %s479_s22  ;;  %p485_p12 = scmp.lt.s32.totalorder %s479_s22, %s479_s22 }
  0x3b   :  { %357 = vmatprep.subr.bf16.mxu0 %v512_v0  ;;  %v147_v20 = vld [vmem:[#allocation7 + $0x28] sm:$0xff]  ;;  %v364_v21 = vpack.c.bf16 %v62_v17, %v61_v16  ;;  %v63_v22 = vld [vmem:[#allocation5 + $0x40] sm:$0xff]  ;;  %v148_v25 = vld [vmem:[#allocation7 + $0x30] sm:$0xff] }
  0x3c   :  { %380 = vmatpush3.bf16.msra.mxu1 %v379_v15  ;;  %v64_v23 = vld [vmem:[#allocation5 + $0x48] sm:$0xff]  ;;  %v385_v24 = vpack.c.bf16 %v147_v20, %v146_v19  ;;  %v149_v26 = vld [vmem:[#allocation7 + $0x38] sm:$0xff]  ;;  %v65_v28 = vld [vmem:[#allocation5 + $0x50] sm:$0xff]  ;;  %p486_p13 = por %p485_p12, %p484_p11 }
  0x3d   :  { %381 = vmatprep.subr.bf16.mxu1 %v512_v0  ;;  %v367_v27 = vpack.c.bf16 %v64_v23, %v63_v22  ;;  %v66_v29 = vld [vmem:[#allocation5 + $0x58] sm:$0xff]  ;;  %v388_v30 = vpack.c.bf16 %v149_v26, %v148_v25  ;;  %v150_v31 = vld [vmem:[#allocation7 + $0x40] sm:$0xff]  ;;  %v151_v32 = vld [vmem:[#allocation7 + $0x48] sm:$0xff] }
  0x3e   :  { %359 = vmatpush3.bf16.msra.mxu0 %v358_v7  ;;  %v370_v33 = vpack.c.bf16 %v66_v29, %v65_v28  ;;  %v67_v34 = vld [vmem:[#allocation5 + $0x60] sm:$0xff]  ;;  %v68_v35 = vld [vmem:[#allocation5 + $0x68] sm:$0xff]  ;;  %v391_v36 = vpack.c.bf16 %v151_v32, %v150_v31  ;;  %v152_v37 = vld [vmem:[#allocation7 + $0x50] sm:$0xff]  ;;  %p487_p0 = pnand %p486_p13, %p480_p10 }
  0x3f   :  { %360 = vmatprep.subr.bf16.mxu0 %v512_v0  ;;  %v153_v38 = vld [vmem:[#allocation7 + $0x58] sm:$0xff]  ;;  %v373_v39 = vpack.c.bf16 %v68_v35, %v67_v34  ;;  %v69_v40 = vld [vmem:[#allocation5 + $0x70] sm:$0xff]  ;;  %v154_v43 = vld [vmem:[#allocation7 + $0x60] sm:$0xff] }
  0x40   :  { %383 = vmatpush3.bf16.msra.mxu1 %v382_v18  ;;  %v70_v41 = vld [vmem:[#allocation5 + $0x78] sm:$0xff]  ;;  %v394_v42 = vpack.c.bf16 %v153_v38, %v152_v37  ;;  %v155_v44 = vld [vmem:[#allocation7 + $0x68] sm:$0xff]  ;;  %v156_v48 = vld [vmem:[#allocation7 + $0x70] sm:$0xff] }
  0x41   :  { %384 = vmatprep.subr.bf16.mxu1 %v512_v0  ;;  %v376_v45 = vpack.c.bf16 %v70_v41, %v69_v40  ;;  %v397_v46 = vpack.c.bf16 %v155_v44, %v154_v43  ;;  %v54_v47 = vld [vmem:[#allocation2] sm:$0xff] }
  0x42   :  { %362 = vmatpush3.bf16.msra.mxu0 %v361_v14  ;;  %v157_v49 = vld [vmem:[#allocation7 + $0x78] sm:$0xff] }
  0x43   :  { %363 = vmatprep.subr.bf16.mxu0 %v512_v0  ;;  %v400_v50 = vpack.c.bf16 %v157_v49, %v156_v48 }
  0x44   :  { %386 = vmatpush3.bf16.msra.mxu1 %v385_v24 }
  0x45   :  { %387 = vmatprep.subr.bf16.mxu1 %v512_v0 }
  0x46   :  { %365 = vmatpush3.bf16.msra.mxu0 %v364_v21 }
  0x47   :  { %366 = vmatprep.subr.bf16.mxu0 %v512_v0 }
  0x48   :  { %389 = vmatpush3.bf16.msra.mxu1 %v388_v30 }
  0x49   :  { %390 = vmatprep.subr.bf16.mxu1 %v512_v0 }
  0x4a   :  { %368 = vmatpush3.bf16.msra.mxu0 %v367_v27 }
  0x4b   :  { %369 = vmatprep.subr.bf16.mxu0 %v512_v0 }
  0x4c   :  { %392 = vmatpush3.bf16.msra.mxu1 %v391_v36 }
  0x4d   :  { %393 = vmatprep.subr.bf16.mxu1 %v512_v0 }
  0x4e   :  { %371 = vmatpush3.bf16.msra.mxu0 %v370_v33 }
  0x4f   :  { %372 = vmatprep.subr.bf16.mxu0 %v512_v0 }
  0x50   :  { %395 = vmatpush3.bf16.msra.mxu1 %v394_v42 }
  0x51   :  { %396 = vmatprep.subr.bf16.mxu1 %v512_v0 }
  0x52   :  { %374 = vmatpush3.bf16.msra.mxu0 %v373_v39 }
  0x53   :  { %375 = vmatprep.subr.bf16.mxu0 %v512_v0 }
  0x54   :  { %398 = vmatpush3.bf16.msra.mxu1 %v397_v46 }
  0x55   :  { %399 = vmatprep.subr.bf16.mxu1 %v512_v0 }
  0x56   :  { %377 = vmatpush3.bf16.msra.mxu0 %v376_v45 }
  0x58   :  { %401 = vmatpush3.bf16.msra.mxu1 %v400_v50 }
  0x59   :  { %317 = vmatmul.mubr.f32.vlgmr.msra.gmra.mrb[0].mxu0 %v54_v47 }
 0x12c   :  { %v137_v51 = vpop.f32.mrb[0].mxu0 }
 0x12d   :  { %v141_v52 = vmax.f32 %v137_v51, 0.0  ;;  %v318_v53 = vpop.f32.mrb[1].mxu0 }
 0x12f   :  { %352 = vmatmul.mubr.f32.vlgmr.msra.gmra.mrb[0].mxu1 %v141_v52 }
 0x202   :  { %v224_v54 = vpop.f32.mrb[0].mxu1 }
 0x203   :  { %v228_v55 = vmul.f32 0.5, %v224_v54  ;;  %v353_v56 = vpop.f32.mrb[1].mxu1 }
 0x205   :  { %411 = vtanh.f32 %v228_v55 }
 0x20f   :  { %v412_v57 = vpop.eup %411 }
 0x210   :  { %v230_v58 = vadd.f32 1.0, %v412_v57 }
 0x212   :  { %v231_v59 = vmul.f32 0.5, %v230_v58 }
 0x214   :  { %v232_v60 = vmul.f32 %v231_v59, %v54_v47 }
 0x216   :  { %233 = vst [vmem:[#allocation8] sm:$0xff] %v232_v60 }
 0x217   :  { %490 = shalt.err (!%p487_p0)
}
 0x218   :  { %s491_s25 = scalar_lea.hbm %s609_s3, 128 }
 0x219   :  { %p492_p1 = scmp.ne.s32.totalorder %s609_s3, %s491_s25  ;;  %p495_p2 = scmp.lt.u32.totalorder %s491_s25, %s609_s3 }
 0x21b   :  { %p497_p3 = pnand %p495_p2, %p492_p1 }
 0x21d   :  { %500 = shalt.err (!%p497_p3)
}
 0x21e   :  { %243 = dma.vmem_to_hbm [thread:$0]  %s241_s21, 128, %s609_s3, [#allocation4]  }
 0x21f   :  { %505 = dma.done.wait [#allocation4], 128  }
 0x220   :  { %506 = vsyncadd [#allocation4], 4294967168 }
 0x221   :  { %247 = vsyncpa [#allocation3], 1 }
 0x222   :  { %248 = vsyncpa [#allocation6], 1 }
 0x223   :  { %249 = vsyncpa [#allocation4], 1 }

</bundles_post_ra>
